<compile_context>
chip_gen: v6e
topology: v6e:2x2x1
jax: 0.10.0
libtpu: 0.0.40
codegen_flags: <defaults>
</compile_context>

<pallas_src>
from functools import partial

import jax
import jax.numpy as jnp
from jax.experimental import pallas as pl
from jax.experimental.pallas import tpu as pltpu


def _round_up(x, m):
    return ((x + m - 1) // m) * m


def _rope_kernel(pos_ref, invf_ref, cos_ref, sin_ref, *, half, scaling,
                 apply_scaling):
    # pos_ref:  (tile, 1)     float32 positions (flattened B*S rows)
    # invf_ref: (1, half)     float32 inverse frequencies (constant block)
    # cos_ref / sin_ref: (tile, 2*half) in the requested output dtype
    pos = pos_ref[...]                        # (tile, 1)
    invf = invf_ref[...]                      # (1, half)
    freqs = pos * invf                        # (tile, half) outer product

    # Half-width transcendentals only (EUP work halved vs. cat(freqs, freqs)).
    c = jnp.cos(freqs)
    s = jnp.sin(freqs)
    if apply_scaling:
        c = c * scaling
        s = s * scaling
    c = c.astype(cos_ref.dtype)
    s = s.astype(sin_ref.dtype)

    # emb = cat(freqs, freqs, dim=-1): write the same result into both halves.
    cos_ref[:, :half] = c
    cos_ref[:, half:] = c
    sin_ref[:, :half] = s
    sin_ref[:, half:] = s


def llama_rotary_embedding(x, position_ids, inv_freq, attention_scaling=1.0,
                           tile_rows=1024):
    """Pallas equivalent of LlamaRotaryEmbedding.forward (rope_type='default').

    x: only its dtype is used (as in the PyTorch module).
    position_ids: [B, S] integer positions.
    inv_freq: [dim // 2] float inverse frequencies.
    Returns (cos, sin), each of shape [B, S, dim] and dtype x.dtype.
    """
    B, S = position_ids.shape
    half = int(inv_freq.shape[0])
    dim = 2 * half
    out_dtype = x.dtype
    rows = B * S

    # Sublane-aligned row tile: 8 rows for f32, 16 for bf16, etc.
    itemsize = jnp.dtype(out_dtype).itemsize
    sub = max(8, 32 // itemsize)
    tile = min(int(tile_rows), _round_up(rows, sub))
    tile = max(_round_up(tile, sub), sub)
    rows_padded = _round_up(rows, tile)

    pos_flat = position_ids.reshape(rows).astype(jnp.float32)
    if rows_padded != rows:
        pos_flat = jnp.pad(pos_flat, (0, rows_padded - rows))
    pos_2d = pos_flat.reshape(rows_padded, 1)
    invf_2d = inv_freq.reshape(1, half).astype(jnp.float32)

    scaling = float(attention_scaling)
    kernel = partial(_rope_kernel, half=half, scaling=scaling,
                     apply_scaling=(scaling != 1.0))

    grid = (rows_padded // tile,)
    out_bytes = 2 * rows * dim * itemsize
    in_bytes = rows * 4 + half * 4
    cost = pl.CostEstimate(
        flops=2 * rows * half,              # outer product (+ optional scaling)
        transcendentals=2 * rows * half,    # cos + sin on the half width
        bytes_accessed=out_bytes + in_bytes,
    )

    cos_flat, sin_flat = pl.pallas_call(
        kernel,
        out_shape=(
            jax.ShapeDtypeStruct((rows_padded, dim), out_dtype),
            jax.ShapeDtypeStruct((rows_padded, dim), out_dtype),
        ),
        grid=grid,
        in_specs=[
            pl.BlockSpec((tile, 1), lambda i: (i, 0)),
            pl.BlockSpec((1, half), lambda i: (0, 0)),   # constant: fetched once
        ],
        out_specs=(
            pl.BlockSpec((tile, dim), lambda i: (i, 0)),
            pl.BlockSpec((tile, dim), lambda i: (i, 0)),
        ),
        compiler_params=pltpu.CompilerParams(
            dimension_semantics=("parallel",),
        ),
        cost_estimate=cost,
    )(pos_2d, invf_2d)

    cos = cos_flat[:rows].reshape(B, S, dim)
    sin = sin_flat[:rows].reshape(B, S, dim)
    return cos, sin


def _compute_default_rope_parameters(rope_theta, rotary_emb_dim):
    """JAX mirror of the HF helper: inv_freq[k] = 1 / theta^(2k / dim)."""
    exponents = jnp.arange(0, rotary_emb_dim, 2, dtype=jnp.float32) / rotary_emb_dim
    inv_freq = 1.0 / (rope_theta ** exponents)
    attention_factor = 1.0
    return inv_freq, attention_factor


# TODO(synk): _dynamic_frequency_update (rope_type='dynamic') is host-side
# module state management, not kernel work; only the 'default' path is ported.

if __name__ == "__main__":
    # Synthetic config (deterministic, no checkpoint):
    rope_theta = 10000.0
    rotary_emb_dim = 32          # -> inv_freq has 16 entries, outputs have dim 32
    batch, seq, hidden = 2, 8, 32

    inv_freq, attention_scaling = _compute_default_rope_parameters(
        rope_theta, rotary_emb_dim
    )

    key = jax.random.PRNGKey(0)
    # x is only used for its dtype in the module.
    x = jax.random.normal(key, (batch, seq, hidden), dtype=jnp.float32)
    position_ids = jnp.broadcast_to(
        jnp.arange(seq, dtype=jnp.int32)[None, :], (batch, seq)
    )

    cos, sin = llama_rotary_embedding(x, position_ids, inv_freq, attention_scaling)
    cos, sin = jax.block_until_ready((cos, sin))

    # Pure-JAX reference check (same math as the PyTorch forward).
    freqs_ref = position_ids.astype(jnp.float32)[:, :, None] * inv_freq[None, None, :]
    emb_ref = jnp.concatenate([freqs_ref, freqs_ref], axis=-1)
    cos_ref = (jnp.cos(emb_ref) * attention_scaling).astype(x.dtype)
    sin_ref = (jnp.sin(emb_ref) * attention_scaling).astype(x.dtype)

    assert cos.shape == (batch, seq, rotary_emb_dim)
    assert sin.shape == (batch, seq, rotary_emb_dim)
    assert cos.dtype == x.dtype and sin.dtype == x.dtype
    assert jnp.allclose(cos, cos_ref, atol=1e-5, rtol=1e-5)
    assert jnp.allclose(sin, sin_ref, atol=1e-5, rtol=1e-5)

    print("KERNEL_OK")
</pallas_src>

<mosaic_0001>
module attributes {stable_mosaic.version = 11 : i64} {
  func.func @_rope_kernel(%arg0: i32, %arg1: memref<16x1xf32, #tpu.memory_space<vmem>>, %arg2: memref<1x16xf32, #tpu.memory_space<vmem>>, %arg3: memref<16x32xf32, #tpu.memory_space<vmem>>, %arg4: memref<16x32xf32, #tpu.memory_space<vmem>>) attributes {dimension_semantics = [#tpu.dimension_semantics<parallel>], iteration_bounds = array<i64: 1>, scalar_prefetch = 0 : i64, scratch_operands = 0 : i64, tpu.core_type = #tpu.core_type<tc>, window_params = [{transform_indices = @transform_0, window_bounds = array<i64: 16, 1>}, {pipeline_mode = #tpu.pipeline_mode<synchronous>, transform_indices = @transform_1, window_bounds = array<i64: 1, 16>}, {transform_indices = @transform_2, window_bounds = array<i64: 16, 32>}, {transform_indices = @transform_3, window_bounds = array<i64: 16, 32>}]} {
    %c0 = arith.constant 0 : index
    %c0_0 = arith.constant 0 : index
    %0 = vector.load %arg1[%c0, %c0_0] : memref<16x1xf32, #tpu.memory_space<vmem>>, vector<16x1xf32>
    %c0_1 = arith.constant 0 : index
    %c0_2 = arith.constant 0 : index
    %1 = vector.load %arg2[%c0_1, %c0_2] : memref<1x16xf32, #tpu.memory_space<vmem>>, vector<1x16xf32>
    %2 = vector.broadcast %0 : vector<16x1xf32> to vector<16x16xf32>
    %3 = vector.broadcast %1 : vector<1x16xf32> to vector<16x16xf32>
    %4 = arith.mulf %2, %3 : vector<16x16xf32>
    %5 = math.cos %4 : vector<16x16xf32>
    %6 = math.sin %4 : vector<16x16xf32>
    %c0_3 = arith.constant 0 : index
    %c0_4 = arith.constant 0 : index
    %7 = vector.load %arg3[%c0_3, %c0_4] : memref<16x32xf32, #tpu.memory_space<vmem>>, vector<16x16xf32>
    tpu.vector_store %arg3[%c0_3, %c0_4], %5 {strides = array<i32>} : memref<16x32xf32, #tpu.memory_space<vmem>>, vector<16x16xf32>,
    %c0_5 = arith.constant 0 : index
    %c16 = arith.constant 16 : index
    %8 = vector.load %arg3[%c0_5, %c16] : memref<16x32xf32, #tpu.memory_space<vmem>>, vector<16x16xf32>
    tpu.vector_store %arg3[%c0_5, %c16], %5 {strides = array<i32>} : memref<16x32xf32, #tpu.memory_space<vmem>>, vector<16x16xf32>,
    %c0_6 = arith.constant 0 : index
    %c0_7 = arith.constant 0 : index
    %9 = vector.load %arg4[%c0_6, %c0_7] : memref<16x32xf32, #tpu.memory_space<vmem>>, vector<16x16xf32>
    tpu.vector_store %arg4[%c0_6, %c0_7], %6 {strides = array<i32>} : memref<16x32xf32, #tpu.memory_space<vmem>>, vector<16x16xf32>,
    %c0_8 = arith.constant 0 : index
    %c16_9 = arith.constant 16 : index
    %10 = vector.load %arg4[%c0_8, %c16_9] : memref<16x32xf32, #tpu.memory_space<vmem>>, vector<16x16xf32>
    tpu.vector_store %arg4[%c0_8, %c16_9], %6 {strides = array<i32>} : memref<16x32xf32, #tpu.memory_space<vmem>>, vector<16x16xf32>,
    return
  }
  func.func @transform_0(%arg0: i32) -> (i32, i32) {
    %c0_i32 = arith.constant 0 : i32
    %c0_i32_0 = arith.constant 0 : i32
    return %arg0, %c0_i32 : i32, i32
  }
  func.func @transform_1(%arg0: i32) -> (i32, i32) {
    %c0_i32 = arith.constant 0 : i32
    %c0_i32_0 = arith.constant 0 : i32
    %c0_i32_1 = arith.constant 0 : i32
    return %c0_i32, %c0_i32_0 : i32, i32
  }
  func.func @transform_2(%arg0: i32) -> (i32, i32) {
    %c0_i32 = arith.constant 0 : i32
    %c0_i32_0 = arith.constant 0 : i32
    return %arg0, %c0_i32 : i32, i32
  }
  func.func @transform_3(%arg0: i32) -> (i32, i32) {
    %c0_i32 = arith.constant 0 : i32
    %c0_i32_0 = arith.constant 0 : i32
    return %arg0, %c0_i32 : i32, i32
  }
}

</mosaic_0001>

<bundles_post_ra>
// kernel: tpu_custom_call.1
= control target key start
LH: loop header
LB: loop body
LE: loop exit
PB: predicated region body
PF: predicated region fallthrough
CT: control target
= control target key end

     0   :  { %9 = vsyncpa [#allocation3], 0  ;;  %v598_v1 = vmov 0   ;;  %s713_s0 = inlined_call_operand.vmem [shape: f32[16,1], index: 0, kind: input, shape index: {}]   ;;  %s714_s1 = inlined_call_operand.vmem [shape: f32[1,16], index: 1, kind: input, shape index: {}]   ;;  %s715_s2 = inlined_call_operand.hbm [shape: f32[16,32], index: 2, kind: output, shape index: {0}]   ;;  %s716_s3 = inlined_call_operand.hbm [shape: f32[16,32], index: 3, kind: output, shape index: {1}]  }
   0x1   :  { %v15_v0 = vld [vmem:[%s713_s0] sm:$0xff]  ;;  %545 = vset.pattern.permute.xlu0 %v598_v1  ;;  %v16_v2 = vld [vmem:[%s713_s0 + $0x8] sm:$0xff] }
   0x2   :  { %20 = vperm.xlu0 %545, %v15_v0  }
   0x3   :  { %10 = vsyncpa [#allocation5], 0  ;;  %v508_v3 = vld [vmem:[%s714_s1] ss:$0 sm:$0xff]  ;;  %v599_v24 = vmov 683565275  }
   0x4   :  { %v600_v28 = vmov 2475754826   ;;  %v601_v30 = vmov 2131351028   ;;  %v602_v32 = vmov 2102212464  }
   0x5   :  { %v603_v34 = vmov 920167782   ;;  %v604_v41 = vmov 1326507024   ;;  %s605_s0 = smov 16   ;;  %s606_s1 = smov [#allocation2]  }
   0x6   :  { %25 = vperm.xlu0 %545, %v16_v2   ;;  %s481_s18 = sshll.u32 %s606_s1, 4  ;;  %s607_s19 = smov [#allocation4]   ;;  %s482_s18 = int_to_ptr.vmem [resolvable:$true] %s481_s18 }
   0x7   :  { %s493_s20 = sshll.u32 %s607_s19, 4  ;;  %s554_s21 = scalar_lea.vmem %s482_s18, 256  ;;  %s494_s20 = int_to_ptr.vmem [resolvable:$true] %s493_s20 }
   0x8   :  { %p555_p0 = scmp.ne.s32.totalorder %s482_s18, %s554_s21  ;;  %p559_p1 = scmp.lt.s32.totalorder %s482_s18, %s482_s18 }
   0x9   :  { %p560_p2 = scmp.lt.s32.totalorder %s554_s21, %s554_s21 }
   0xb   :  { %p561_p3 = por %p560_p2, %p559_p1 }
   0xd   :  { %p562_p4 = pnand %p561_p3, %p555_p0 }
  0x7d   :  { %v21_v4 = vpop.permute.xlu0 %20 }
  0x7e   :  { %v639_v5 = vmul.f32 %v508_v3, %v21_v4 }
  0x80   :  { %v36_v6 = vand.u32 2147483647, %v639_v5  ;;  %v39_v7 = vand.u32 2139095040, %v639_v5  ;;  %vm38_vm14 = vcmp.lt.s32.totalorder %v639_v5, 0 }
  0x81   :  { %v26_v8 = vpop.permute.xlu0 %25 }
  0x82   :  { %v40_v9 = vshrl.u32 %v39_v7, 23  ;;  %v643_v10 = vmul.f32 %v508_v3, %v26_v8  ;;  %v43_v11 = vand.u32 8388607, %v36_v6  ;;  %vm37_vm15 = vcmp.le.f32.partialorder %v36_v6, 0.7853982 }
  0x84   :  { %v509_v12 = vadd.s32 4294967169, %v40_v9  ;;  %v142_v13 = vand.u32 2139095040, %v643_v10  ;;  %v44_v15 = vor.u32 8388608, %v43_v11  ;;  %v139_v17 = vand.u32 2147483647, %v643_v10 }
  0x86   :  { %v46_v14 = vadd.s32 1, %v509_v12  ;;  %v143_v16 = vshrl.u32 %v142_v13, 23  ;;  %v649_v22 = vshll.u32 %v44_v15, 8  ;;  %v146_v26 = vand.u32 8388607, %v139_v17 }
  0x88   :  { %vm47_vm0 = vcmp.gt.s32.totalorder %v46_v14, 0  ;;  %v513_v19 = vadd.s32 4294967169, %v143_v16  ;;  %v147_v56 = vor.u32 8388608, %v146_v26 }
  0x89   :  { %v48_v18 = vsel %vm47_vm0, %v46_v14, 0  ;;  %vm141_vm0 = vcmp.lt.s32.totalorder %v643_v10, 0 }
  0x8a   :  { %v49_v20 = vshrl.u32 %v48_v18, 5  ;;  %v50_v21 = vand.u32 31, %v48_v18  ;;  %v149_v27 = vadd.s32 1, %v513_v19  ;;  %v187_v7 = vshll.u32 %v147_v56, 8 }
  0x8c   :  { %v51_v23 = vsub.s32 32, %v50_v21  ;;  %v53_v25 = vshll.u32 %v599_v24, %v50_v21  ;;  %v56_v29 = vshll.u32 %v600_v28, %v50_v21  ;;  %v59_v31 = vshll.u32 %v601_v30, %v50_v21 }
  0x8d   :  { %v62_v33 = vshll.u32 %v602_v32, %v50_v21  ;;  %v65_v35 = vshll.u32 %v603_v34, %v50_v21  ;;  %vm68_vm1 = vcmp.lt.s32.totalorder %v49_v20, 1  ;;  %vm70_vm2 = vcmp.lt.s32.totalorder %v49_v20, 3 }
  0x8e   :  { %v54_v36 = vshrl.u32 %v600_v28, %v51_v23  ;;  %v57_v37 = vshrl.u32 %v601_v30, %v51_v23  ;;  %v60_v38 = vshrl.u32 %v602_v32, %v51_v23  ;;  %v52_v39 = vshrl.u32 %v599_v24, %v51_v23 }
  0x8f   :  { %v63_v40 = vshrl.u32 %v603_v34, %v51_v23  ;;  %v66_v42 = vshrl.u32 %v604_v41, %v51_v23  ;;  %vm150_vm3 = vcmp.gt.s32.totalorder %v149_v27, 0  ;;  %vm71_vm4 = vcmp.lt.s32.totalorder %v49_v20, 4 }
  0x90   :  { %v55_v43 = vor.u32 %v54_v36, %v53_v25  ;;  %v58_v44 = vor.u32 %v57_v37, %v56_v29  ;;  %v61_v45 = vor.u32 %v60_v38, %v59_v31  ;;  %v151_v48 = vsel %vm150_vm3, %v149_v27, 0 }
  0x91   :  { %v64_v46 = vor.u32 %v63_v40, %v62_v33  ;;  %v67_v47 = vor.u32 %v66_v42, %v65_v35  ;;  %vm69_vm5 = vcmp.lt.s32.totalorder %v49_v20, 2  ;;  %v153_v59 = vand.u32 31, %v151_v48 }
  0x92   :  { %v72_v49 = vsel %vm68_vm1, %v52_v39, %v55_v43  ;;  %v73_v50 = vsel %vm71_vm4, %v61_v45, 2102212464  ;;  %v76_v51 = vsel %vm68_vm1, %v55_v43, %v58_v44  ;;  %v80_v52 = vsel %vm68_vm1, %v58_v44, %v61_v45 }
  0x93   :  { %v74_v53 = vsel %vm70_vm2, %v58_v44, %v73_v50  ;;  %v77_v54 = vsel %vm71_vm4, %v64_v46, 920167782  ;;  %v81_v55 = vsel %vm71_vm4, %v67_v47, 1326507024  ;;  %v152_v3 = vshrl.u32 %v151_v48, 5 }
  0x94   :  { %v78_v57 = vsel %vm70_vm2, %v61_v45, %v77_v54  ;;  %v82_v58 = vsel %vm70_vm2, %v64_v46, %v81_v55  ;;  %v75_v60 = vsel %vm69_vm5, %v72_v49, %v74_v53  ;;  %v154_v4 = vsub.s32 32, %v153_v59 }
  0x95   :  { %v79_v61 = vsel %vm69_vm5, %v76_v51, %v78_v57  ;;  %v83_v62 = vsel %vm69_vm5, %v80_v52, %v82_v58  ;;  %v91_v8 = vmul.u32 %v649_v22, %v75_v60  ;;  %v156_v9 = vshll.u32 %v599_v24, %v153_v59 }
  0x96   :  { %v662_v63 = vmul.u32.u64.low %v649_v22, %v83_v62  ;;  %v663_v0 = vmul.u32.u64.high %v649_v22, %v83_v62, %v662_v63  ;;  %v666_v1 = vmul.u32.u64.low %v649_v22, %v79_v61  ;;  %v667_v2 = vmul.u32.u64.high %v649_v22, %v79_v61, %v666_v1 }
  0x97   :  { %v159_v11 = vshll.u32 %v600_v28, %v153_v59  ;;  %v162_v12 = vshll.u32 %v601_v30, %v153_v59  ;;  %v157_v13 = vshrl.u32 %v600_v28, %v154_v4  ;;  %v160_v14 = vshrl.u32 %v601_v30, %v154_v4 }
  0x98   :  { %v163_v15 = vshrl.u32 %v602_v32, %v154_v4  ;;  %v165_v16 = vshll.u32 %v602_v32, %v153_v59  ;;  %vm93_vm6 = vc.u32 %v663_v0, %v666_v1  ;;  %v94_v18 = vadd.s32 1, %v667_v2 }
  0x99   :  { %v166_v19 = vshrl.u32 %v603_v34, %v154_v4  ;;  %v168_v20 = vshll.u32 %v603_v34, %v153_v59  ;;  %v158_v21 = vor.u32 %v157_v13, %v156_v9  ;;  %v161_v23 = vor.u32 %v160_v14, %v159_v11 }
  0x9a   :  { %v164_v25 = vor.u32 %v163_v15, %v162_v12  ;;  %v169_v26 = vshrl.u32 %v604_v41, %v154_v4  ;;  %v95_v22 = vsel %vm93_vm6, %v94_v18, %v667_v2  ;;  %vm171_vm7 = vcmp.lt.s32.totalorder %v152_v3, 1 }
  0x9b   :  { %v167_v27 = vor.u32 %v166_v19, %v165_v16  ;;  %vm174_vm8 = vcmp.lt.s32.totalorder %v152_v3, 4  ;;  %v96_v28 = vadd.s32 %v95_v22, %v91_v8  ;;  %vm173_vm9 = vcmp.lt.s32.totalorder %v152_v3, 3 }
  0x9c   :  { %v170_v29 = vor.u32 %v169_v26, %v168_v20  ;;  %v176_v30 = vsel %vm174_vm8, %v164_v25, 2102212464  ;;  %v155_v31 = vshrl.u32 %v599_v24, %v154_v4  ;;  %v179_v32 = vsel %vm171_vm7, %v158_v21, %v161_v23 }
  0x9d   :  { %v180_v33 = vsel %vm174_vm8, %v167_v27, 920167782  ;;  %v183_v35 = vsel %vm171_vm7, %v161_v23, %v164_v25  ;;  %v97_v36 = vadd.s32 536870912, %v96_v28  ;;  %vm172_vm10 = vcmp.lt.s32.totalorder %v152_v3, 2 }
  0x9e   :  { %v181_v34 = vsel %vm173_vm9, %v164_v25, %v180_v33  ;;  %v184_v37 = vsel %vm174_vm8, %v170_v29, 1326507024  ;;  %v175_v38 = vsel %vm171_vm7, %v155_v31, %v158_v21  ;;  %v177_v39 = vsel %vm173_vm9, %v161_v23, %v176_v30 }
  0x9f   :  { %v182_v40 = vsel %vm172_vm10, %v179_v32, %v181_v34  ;;  %v185_v41 = vsel %vm173_vm9, %v167_v27, %v184_v37  ;;  %v98_v42 = vshrl.u32 %v97_v36, 30  ;;  %v178_v48 = vsel %vm172_vm10, %v175_v38, %v177_v39 }
  0xa0   :  { %v186_v43 = vsel %vm172_vm10, %v183_v35, %v185_v41  ;;  %v677_v44 = vmul.u32.u64.low %v187_v7, %v182_v40  ;;  %v678_v45 = vmul.u32.u64.high %v187_v7, %v182_v40, %v677_v44  ;;  %v194_v51 = vmul.u32 %v187_v7, %v178_v48 }
  0xa1   :  { %v680_v46 = vmul.u32.u64.low %v187_v7, %v186_v43  ;;  %v681_v47 = vmul.u32.u64.high %v187_v7, %v186_v43, %v680_v46  ;;  %v99_v24 = vshll.u32 %v98_v42, 30  ;;  %v92_v63 = vadd.s32 %v666_v1, %v663_v0 }
  0xa2   :  { %v197_v50 = vadd.s32 1, %v678_v45  ;;  %vm140_vm1 = vcmp.le.f32.partialorder %v139_v17, 0.7853982  ;;  %vm450_vm2 = vcmask 130048   ;;  %vm128_vm9 = vweird.f32 %v639_v5 }
  0xa3   :  { %v100_v49 = vsub.s32 %v96_v28, %v99_v24  ;;  %vm196_vm11 = vc.u32 %v681_v47, %v677_v44  ;;  %v195_v23 = vadd.s32 %v677_v44, %v681_v47  ;;  %v122_v28 = vsub.s32 4, %v98_v42 }
  0xa4   :  { %v198_v53 = vsel %vm196_vm11, %v197_v50, %v678_v45 }
  0xa5   :  { %v102_v52 = vsub.s32 0, %v100_v49  ;;  %v199_v54 = vadd.s32 %v198_v53, %v194_v51  ;;  %v123_v35 = vsel %vm38_vm14, %v122_v28, %v98_v42 }
  0xa6   :  { %v125_v37 = vsel %vm37_vm15, 0, %v123_v35 }
  0xa7   :  { %v510_v55 = vmin.u32 %v102_v52, %v100_v49  ;;  %v200_v56 = vadd.s32 536870912, %v199_v54  ;;  %v335_v40 = vadd.s32 3, %v125_v37  ;;  %v129_v45 = vand.u32 3, %v125_v37 }
  0xa9   :  { %v104_v57 = vclz %v510_v55  ;;  %v201_v58 = vshrl.u32 %v200_v56, 30  ;;  %v336_v44 = vand.u32 3, %v335_v40  ;;  %vm134_vm4 = vcmp.eq.s32.totalorder %v129_v45, 2 }
  0xaa   :  { %vm131_vm6 = vcmp.eq.s32.totalorder %v129_v45, 0  ;;  %vm130_vm8 = vcmp.lt.s32.totalorder %v129_v45, 2 }
  0xab   :  { %v511_v59 = vadd.s32 4294967294, %v104_v57  ;;  %v202_v60 = vshll.u32 %v201_v58, 30  ;;  %v225_v41 = vsub.s32 4, %v201_v58  ;;  %vm341_vm3 = vcmp.eq.s32.totalorder %v336_v44, 2 }
  0xac   :  { %vm338_vm5 = vcmp.eq.s32.totalorder %v336_v44, 0  ;;  %vm337_vm7 = vcmp.lt.s32.totalorder %v336_v44, 2 }
  0xad   :  { %vm512_vm12 = vcmp.lt.s32.totalorder %v511_v59, 0  ;;  %v203_v62 = vsub.s32 %v199_v54, %v202_v60  ;;  %v226_v42 = vsel %vm141_vm0, %v225_v41, %v201_v58 }
  0xae   :  { %v107_v61 = vsel %vm512_vm12, 0, %v511_v59 }
  0xaf   :  { %v108_v2 = vsub.s32 32, %v107_v61  ;;  %v112_v3 = vsub.s32 4294967266, %v107_v61  ;;  %v205_v4 = vsub.s32 0, %v203_v62  ;;  %v109_v7 = vshll.u32 %v100_v49, %v107_v61 }
  0xb0   :  { %v228_v49 = vsel %vm140_vm1, 0, %v226_v42 }
  0xb1   :  { %v110_v8 = vshrl.u32 %v92_v63, %v108_v2  ;;  %v113_v9 = vadd.s32 127, %v112_v3  ;;  %v514_v11 = vmin.u32 %v205_v4, %v203_v62  ;;  %v439_v55 = vadd.s32 3, %v228_v49 }
  0xb2   :  { %v232_v58 = vand.u32 3, %v228_v49 }
  0xb3   :  { %v111_v12 = vor.u32 %v110_v8, %v109_v7  ;;  %v114_v13 = vshll.u32 %v113_v9, 23  ;;  %v207_v14 = vclz %v514_v11  ;;  %v440_v59 = vand.u32 3, %v439_v55 }
  0xb4   :  { %vm237_vm10 = vcmp.eq.s32.totalorder %v232_v58, 2  ;;  %vm234_vm12 = vcmp.eq.s32.totalorder %v232_v58, 0 }
  0xb5   :  { %v115_v15 = vor.u32 4788187, %v114_v13  ;;  %v515_v16 = vadd.s32 4294967294, %v207_v14  ;;  %v118_v19 = vcvt.s32.f32 %v111_v12  ;;  %vm445_vm11 = vcmp.eq.s32.totalorder %v440_v59, 2 }
  0xb7   :  { %v116_v18 = vand.u32 2147483647, %v115_v15  ;;  %vm516_vm13 = vcmp.lt.s32.totalorder %v515_v16, 0 }
  0xb8   :  { %v210_v21 = vsel %vm516_vm13, 0, %v515_v16  ;;  %vm442_vm13 = vcmp.eq.s32.totalorder %v440_v59, 0 }
  0xb9   :  { %v119_v20 = vmul.f32 %v118_v19, %v116_v18  ;;  %v211_v0 = vsub.s32 32, %v210_v21  ;;  %v215_v1 = vsub.s32 4294967266, %v210_v21  ;;  %v212_v26 = vshll.u32 %v203_v62, %v210_v21 }
  0xbb   :  { %v120_v25 = vxor.u32 2147483648, %v119_v20  ;;  %v213_v22 = vshrl.u32 %v195_v23, %v211_v0  ;;  %v216_v27 = vadd.s32 127, %v215_v1 }
  0xbd   :  { %v121_v29 = vsel %vm38_vm14, %v120_v25, %v119_v20  ;;  %v214_v30 = vor.u32 %v213_v22, %v212_v26  ;;  %v217_v31 = vshll.u32 %v216_v27, 23  ;;  %vm233_vm14 = vcmp.lt.s32.totalorder %v232_v58, 2 }
  0xbe   :  { %v124_v32 = vsel %vm37_vm15, %v639_v5, %v121_v29  ;;  %vm441_vm15 = vcmp.lt.s32.totalorder %v440_v59, 2 }
  0xbf   :  { %546 = vcosq.f32 %v124_v32  ;;  %v218_v33 = vor.u32 4788187, %v217_v31  ;;  %v221_v34 = vcvt.s32.f32 %v214_v30 }
  0xc0   :  { %548 = vsinq.f32 %v124_v32 }
  0xc1   :  { %v219_v36 = vand.u32 2147483647, %v218_v33 }
  0xc3   :  { %v222_v38 = vmul.f32 %v221_v34, %v219_v36 }
  0xc5   :  { %v223_v39 = vxor.u32 2147483648, %v222_v38 }
  0xc7   :  { %v224_v43 = vsel %vm141_vm0, %v223_v39, %v222_v38  ;;  %vm231_vm0 = vweird.f32 %v643_v10 }
  0xc8   :  { %v227_v6 = vsel %vm140_vm1, %v643_v10, %v224_v43  ;;  %vm461_vm1 = vcmask 261248  }
  0xc9   :  { %550 = vcosq.f32 %v227_v6 }
  0xca   :  { %552 = vsinq.f32 %v227_v6 }
  0xcc   :  { %v547_v46 = vpop.eup %546 }
  0xcd   :  { %v549_v47 = vpop.eup %548  ;;  %v135_v24 = vxor.u32 2147483648, %v547_v46 }
  0xce   :  { %v132_v48 = vxor.u32 2147483648, %v549_v47 }
  0xcf   :  { %v343_v50 = vsel %vm341_vm3, %v135_v24, %v549_v47  ;;  %v136_v51 = vsel %vm134_vm4, %v135_v24, %v549_v47 }
  0xd0   :  { %v340_v17 = vsel %vm338_vm5, %v547_v46, %v132_v48  ;;  %v133_v52 = vsel %vm131_vm6, %v547_v46, %v132_v48 }
  0xd1   :  { %v344_v53 = vsel %vm337_vm7, %v340_v17, %v343_v50  ;;  %v137_v54 = vsel %vm130_vm8, %v133_v52, %v136_v51 }
  0xd2   :  { %v345_v56 = vsel %vm128_vm9, nan, %v344_v53  ;;  %v138_v57 = vsel %vm128_vm9, nan, %v137_v54 }
  0xd3   :  { %468 = vrot.lane.b32.xlu0 %v345_v56, %s605_s0  ;;  %464 = vst.msk [vmem:[#allocation4] sm:$0xff] %vm450_vm2, %v345_v56  ;;  %455 = vrot.lane.b32.xlu1 %v138_v57, %s605_s0  ;;  %451 = vst.msk [vmem:[#allocation2] sm:$0xff] %vm450_vm2, %v138_v57 }
  0xd6   :  { %v551_v60 = vpop.eup %550 }
  0xd7   :  { %v553_v61 = vpop.eup %552  ;;  %v238_v62 = vxor.u32 2147483648, %v551_v60 }
  0xd8   :  { %v235_v63 = vxor.u32 2147483648, %v553_v61 }
  0xd9   :  { %v239_v5 = vsel %vm237_vm10, %v238_v62, %v553_v61  ;;  %v447_v2 = vsel %vm445_vm11, %v238_v62, %v553_v61 }
  0xda   :  { %v236_v3 = vsel %vm234_vm12, %v551_v60, %v235_v63  ;;  %v444_v4 = vsel %vm442_vm13, %v551_v60, %v235_v63 }
  0xdb   :  { %v240_v7 = vsel %vm233_vm14, %v236_v3, %v239_v5  ;;  %v448_v8 = vsel %vm441_vm15, %v444_v4, %v447_v2 }
  0xdc   :  { %v241_v9 = vsel %vm231_vm0, nan, %v240_v7  ;;  %v449_v11 = vsel %vm231_vm0, nan, %v448_v8 }
  0xdd   :  { %457 = vrot.lane.b32.xlu1 %v241_v9, %s605_s0  ;;  %452 = vst.msk [vmem:[#allocation2 + $0x8] sm:$0xff] %vm450_vm2, %v241_v9  ;;  %465 = vst.msk [vmem:[#allocation4 + $0x8] sm:$0xff] %vm450_vm2, %v449_v11 }
  0xe1   :  { %470 = vrot.lane.b32.xlu1 %v449_v11, %s605_s0 }
 0x145   :  { %v456_v12 = vpop.permute.xlu1 %455  ;;  %v469_v13 = vpop.permute.xlu0 %468 }
 0x146   :  { %462 = vst.msk [vmem:[#allocation2] sm:$0xff] %vm461_vm1, %v456_v12  ;;  %474 = vst.msk [vmem:[#allocation4] sm:$0xff] %vm461_vm1, %v469_v13 }
 0x14f   :  { %v458_v10 = vpop.permute.xlu1 %457 }
 0x150   :  { %463 = vst.msk [vmem:[#allocation2 + $0x8] sm:$0xff] %vm461_vm1, %v458_v10 }
 0x151   :  { %565 = shalt.err (!%p562_p4)
}
 0x152   :  { %s608_s22 = smov 128   ;;  %s609_s23 = smov 8  }
 0x153   :  { %487 = dma.vmem_to_hbm [thread:$0]  %s482_s18, 256, %s715_s2, [#allocation3], %s608_s22, %s608_s22, %s609_s23   ;;  %v471_v14 = vpop.permute.xlu1 %470 }
 0x154   :  { %475 = vst.msk [vmem:[#allocation4 + $0x8] sm:$0xff] %vm461_vm1, %v471_v14  ;;  %s574_s26 = scalar_lea.vmem %s494_s20, 256  ;;  %p579_p6 = scmp.lt.s32.totalorder %s494_s20, %s494_s20 }
 0x155   :  { %p575_p5 = scmp.ne.s32.totalorder %s494_s20, %s574_s26  ;;  %p580_p7 = scmp.lt.s32.totalorder %s574_s26, %s574_s26 }
 0x157   :  { %p581_p8 = por %p580_p7, %p579_p6 }
 0x159   :  { %p582_p9 = pnand %p581_p8, %p575_p5 }
 0x15b   :  { %585 = shalt.err (!%p582_p9)
}
 0x15c   :  { %499 = dma.vmem_to_hbm [thread:$0]  %s494_s20, 256, %s716_s3, [#allocation5], %s608_s22, %s608_s22, %s609_s23  }
 0x15d   :  { %594 = dma.done.wait [#allocation3], 256  }
 0x15e   :  { %595 = vsyncadd [#allocation3], 4294967040 }
 0x15f   :  { %596 = dma.done.wait [#allocation5], 256  }
 0x160   :  { %597 = vsyncadd [#allocation5], 4294967040 }
 0x161   :  { %506 = vsyncpa [#allocation3], 1 }
 0x162   :  { %507 = vsyncpa [#allocation5], 1 }

</bundles_post_ra>
